<compile_context>
chip_gen: v7x
topology: tpu7x:2x2x1
jax: 0.10.0
libtpu: 0.0.40
codegen_flags: <defaults>
</compile_context>

<pallas_src>
import jax
import jax.numpy as jnp
from jax.experimental import pallas as pl
from jax.experimental.pallas import tpu as pltpu

LANE = 128
SUBLANE = 8


def _round_up(x, m=LANE):
    return ((x + m - 1) // m) * m


# ---------------------------------------------------------------------------
# Fused forward kernel.
# ---------------------------------------------------------------------------
def _make_fused_kernel(n_layers, n_relations):
    R = n_relations

    def kernel(*refs):
        (adj1_ref, x1_ref, inv1_ref, pool1_ref,
         adj2_ref, x2_ref, inv2_ref, pool2_ref,
         w_out_ref, b_out_ref,
         lin_w1_ref, lin_w2_ref, lin_b_ref) = refs[:13]
        layer_refs = refs[13:13 + 2 * n_layers]
        out_ref = refs[13 + 2 * n_layers]

        def graph_embedding(adj_ref, x_ref, inv_ref, pool_ref):
            n = x_ref.shape[0]
            h_bf = x_ref[...]                                   # [n, d_pad] bf16
            for layer in range(n_layers):                       # static unroll
                w_rel_ref = layer_refs[2 * layer]               # [R, d_in_pad, H_PAD] bf16
                w_root_ref = layer_refs[2 * layer + 1]          # [d_in_pad, H_PAD]    bf16
                # root / self term, f32 accumulation on the MXU
                acc = jnp.dot(h_bf, w_root_ref[...],
                              preferred_element_type=jnp.float32)        # [n, H_PAD] f32
                # all-relation messages in ONE batched MXU matmul on the exact
                # binary adjacency:  [R*n, n] @ [n, d_in] -> [R*n, d_in]
                msgs = jnp.dot(adj_ref[...], h_bf,
                               preferred_element_type=jnp.float32)
                # per-(relation, dst) mean normalisation in f32
                msgs = msgs * inv_ref[...]
                msgs_bf = msgs.astype(jnp.bfloat16)
                for r in range(R):                              # static unroll over relations
                    acc = acc + jnp.dot(
                        msgs_bf[r * n:(r + 1) * n, :], w_rel_ref[r],
                        preferred_element_type=jnp.float32)
                h_bf = jnp.maximum(acc, 0.0).astype(jnp.bfloat16)   # ReLU in f32, cast for MXU
            # output projection (lane-dense, 128-padded columns) + bias
            z = jnp.dot(h_bf, w_out_ref[...],
                        preferred_element_type=jnp.float32) + b_out_ref[...]   # [n, O_PAD]
            # global mean pool: [B, n] @ [n, O_PAD] in f32
            return jnp.dot(pool_ref[...], z, preferred_element_type=jnp.float32)

        e1 = graph_embedding(adj1_ref, x1_ref, inv1_ref, pool1_ref)
        e2 = graph_embedding(adj2_ref, x2_ref, inv2_ref, pool2_ref)
        # Final linear over concat([e1, e2]) as a split matmul (no in-kernel
        # concatenate needed); output is 128-lane dense.
        out_ref[...] = (
            jnp.dot(e1, lin_w1_ref[...], preferred_element_type=jnp.float32)
            + jnp.dot(e2, lin_w2_ref[...], preferred_element_type=jnp.float32)
            + lin_b_ref[...])

    return kernel


def fused_forward(adj1, x1, inv1, pool1, adj2, x2, inv2, pool2, params,
                  *, n_layers, n_relations):
    B = pool1.shape[0]
    final_pad = params["lin_w1"].shape[1]

    inputs = [adj1, x1, inv1, pool1, adj2, x2, inv2, pool2,
              params["w_out"], params["b_out"],
              params["lin_w1"], params["lin_w2"], params["lin_b"]]
    for layer in range(n_layers):
        inputs.append(params["w_rel"][layer])
        inputs.append(params["w_root"][layer])

    vmem = pl.BlockSpec(memory_space=pltpu.MemorySpace.VMEM)
    return pl.pallas_call(
        _make_fused_kernel(n_layers, n_relations),
        out_shape=jax.ShapeDtypeStruct((B, final_pad), jnp.float32),
        in_specs=[vmem] * len(inputs),
        out_specs=vmem,
    )(*inputs)


# ---------------------------------------------------------------------------
# JAX glue: densify edge lists (relation-stacked wide layout, exact binary
# adjacency + f32 inverse-degree), mean-pool matrix, (8,128) padding.
# Jitted together with the kernel.
# TODO(synk): for large N the dense adjacency should be replaced by in-kernel
# sparse accumulation (edge lists via scalar prefetch) to avoid the O(N^2) wall.
# ---------------------------------------------------------------------------
def densify_adj_wide(edge_index, edge_type, num_nodes_pad, num_relations):
    """adj[(r*Np + dst), src] = edge multiplicity; inv = 1/deg_r(dst)."""
    src, dst = edge_index[0], edge_index[1]
    rows = edge_type * num_nodes_pad + dst
    adj = jnp.zeros((num_relations * num_nodes_pad, num_nodes_pad), jnp.float32)
    adj = adj.at[rows, src].add(1.0)
    deg = adj.sum(axis=1, keepdims=True)
    inv = 1.0 / jnp.maximum(deg, 1.0)
    return adj.astype(jnp.bfloat16), inv.astype(jnp.float32)


def pool_matrix(batch_assign, batch_size):
    onehot = (batch_assign[None, :] == jnp.arange(batch_size)[:, None]).astype(jnp.float32)
    counts = onehot.sum(axis=1, keepdims=True)
    return onehot / jnp.maximum(counts, 1.0)


# ---------------------------------------------------------------------------
# Parameters (deterministic init, padded/cast once to kernel-friendly layouts).
# ---------------------------------------------------------------------------
def init_params(key, *, n_layers, n_relations, embed_dim, hidden_dim, out_dim):
    e_pad = _round_up(embed_dim)
    h_pad = _round_up(hidden_dim)
    o_pad = _round_up(out_dim)
    f_pad = LANE  # final linear output, padded from width 1 to 128 lanes

    keys = jax.random.split(key, 2 * n_layers + 4)
    k = iter(keys)

    w_rel, w_root = [], []
    for layer in range(n_layers):
        d_in = embed_dim if layer == 0 else hidden_dim
        d_in_pad = e_pad if layer == 0 else h_pad
        wr = 0.1 * jax.random.normal(next(k), (n_relations, d_in, hidden_dim), jnp.float32)
        ws = 0.1 * jax.random.normal(next(k), (d_in, hidden_dim), jnp.float32)
        wr_p = jnp.zeros((n_relations, d_in_pad, h_pad), jnp.float32)
        wr_p = wr_p.at[:, :d_in, :hidden_dim].set(wr)
        ws_p = jnp.zeros((d_in_pad, h_pad), jnp.float32)
        ws_p = ws_p.at[:d_in, :hidden_dim].set(ws)
        w_rel.append(wr_p.astype(jnp.bfloat16))
        w_root.append(ws_p.astype(jnp.bfloat16))

    w_out = 0.1 * jax.random.normal(next(k), (hidden_dim, out_dim), jnp.float32)
    b_out = 0.1 * jax.random.normal(next(k), (1, out_dim), jnp.float32)
    lin_w = 0.1 * jax.random.normal(next(k), (2 * out_dim, 1), jnp.float32)
    lin_b = 0.1 * jax.random.normal(next(k), (1, 1), jnp.float32)

    w_out_p = jnp.zeros((h_pad, o_pad), jnp.float32).at[:hidden_dim, :out_dim].set(w_out)
    b_out_p = jnp.zeros((1, o_pad), jnp.float32).at[:, :out_dim].set(b_out)
    lin_w1_p = jnp.zeros((o_pad, f_pad), jnp.float32).at[:out_dim, 0].set(lin_w[:out_dim, 0])
    lin_w2_p = jnp.zeros((o_pad, f_pad), jnp.float32).at[:out_dim, 0].set(lin_w[out_dim:, 0])
    lin_b_p = jnp.zeros((1, f_pad), jnp.float32).at[0, 0].set(lin_b[0, 0])

    return {
        "w_rel": w_rel,
        "w_root": w_root,
        "w_out": w_out_p.astype(jnp.bfloat16),
        "b_out": b_out_p,
        "lin_w1": lin_w1_p,
        "lin_w2": lin_w2_p,
        "lin_b": lin_b_p,
        "embed_pad": e_pad,
    }


# ---------------------------------------------------------------------------
# Forward pass (jitted; num_graphs / layer counts are static).
# ---------------------------------------------------------------------------
def dialog_discriminator_forward(params, x1, ei1, et1, b1, x2, ei2, et2, b2,
                                 *, num_graphs, n_layers, n_relations):
    # TODO(synk): GraphEmbedding source was not provided with the module; a
    # standard RGCN (mean aggregation, no per-layer bias) + linear projection +
    # global mean-pool embedding is assumed.
    e_pad = params["lin_w1"].shape[0] * 0 + params["w_rel"][0].shape[1]  # padded d_in of layer 0

    def prep(x, ei, et, b):
        n, d = x.shape
        n_pad = _round_up(n, SUBLANE)
        xp = jnp.zeros((n_pad, e_pad), jnp.float32).at[:n, :d].set(x).astype(jnp.bfloat16)
        adj, inv = densify_adj_wide(ei, et, n_pad, n_relations)
        bp = jnp.pad(b, (0, n_pad - n), constant_values=num_graphs)  # padded nodes match no graph
        pool = pool_matrix(bp, num_graphs)
        return adj, xp, inv, pool

    adj1, xp1, inv1, pool1 = prep(x1, ei1, et1, b1)
    adj2, xp2, inv2, pool2 = prep(x2, ei2, et2, b2)
    out = fused_forward(adj1, xp1, inv1, pool1,
                        adj2, xp2, inv2, pool2,
                        params, n_layers=n_layers, n_relations=n_relations)
    # column 0 of the lane-padded output == torch `self.lin(x).squeeze()`
    return out[:, 0]


forward_jit = jax.jit(
    dialog_discriminator_forward,
    static_argnames=("num_graphs", "n_layers", "n_relations"),
)


# ---------------------------------------------------------------------------
def _make_graph(key, nodes_per_graph, batch_size, embed_dim, n_edges, n_relations):
    kx, ks, kd, kt = jax.random.split(key, 4)
    n_total = nodes_per_graph * batch_size
    x = jax.random.normal(kx, (n_total, embed_dim), jnp.float32)
    # edges stay within their own graph: local index + per-graph offset
    graph_of_edge = jax.random.randint(ks, (n_edges,), 0, batch_size)
    src_local = jax.random.randint(kd, (n_edges,), 0, nodes_per_graph)
    dst_local = jax.random.randint(kt, (n_edges,), 0, nodes_per_graph)
    offset = graph_of_edge * nodes_per_graph
    edge_index = jnp.stack([src_local + offset, dst_local + offset], axis=0)
    edge_type = jax.random.randint(
        jax.random.fold_in(key, 99), (n_edges,), 0, n_relations
    )
    batch_assign = jnp.repeat(jnp.arange(batch_size), nodes_per_graph)
    return x, edge_index, edge_type, batch_assign


if __name__ == "__main__":
    key = jax.random.PRNGKey(0)
    k_model, k_g1, k_g2 = jax.random.split(key, 3)

    batch_size = 2
    nodes_per_graph = 16
    embed_dim = 32
    hidden_dim = 32
    out_dim = 10
    n_relations = 4
    n_layers = 1
    n_edges = 48

    params = init_params(
        k_model,
        n_layers=n_layers,
        n_relations=n_relations,
        embed_dim=embed_dim,
        hidden_dim=hidden_dim,
        out_dim=out_dim,
    )

    x1, ei1, ea1, b1 = _make_graph(
        k_g1, nodes_per_graph, batch_size, embed_dim, n_edges, n_relations
    )
    x2, ei2, ea2, b2 = _make_graph(
        k_g2, nodes_per_graph, batch_size, embed_dim, n_edges, n_relations
    )

    out = forward_jit(
        params, x1, ei1, ea1, b1, x2, ei2, ea2, b2,
        num_graphs=batch_size, n_layers=n_layers, n_relations=n_relations,
    )
    jax.block_until_ready(out)
    assert out.shape == (batch_size,)
    print("KERNEL_OK")
</pallas_src>

<mosaic_0001>
module attributes {stable_mosaic.version = 11 : i64} {
  func.func private @main(%arg0: i32) attributes {dimension_semantics = [#tpu.dimension_semantics<core_parallel>], iteration_bounds = array<i64: 2>, tpu.core_type = #tpu.core_type<sc_scalar_subcore>, window_params = []} {
    return
  }
}

module attributes {stable_mosaic.version = 11 : i64} {
  func.func private @main(%arg0: i32) attributes {dimension_semantics = [#tpu.dimension_semantics<core_parallel>], iteration_bounds = array<i64: 2>, tpu.core_type = #tpu.core_type<sc_scalar_subcore>, window_params = []} {
    return
  }
}

module attributes {stable_mosaic.version = 11 : i64} {
  func.func @kernel(%arg0: memref<128x32xbf16, #tpu.memory_space<vmem>>, %arg1: memref<32x128xbf16, #tpu.memory_space<vmem>>, %arg2: memref<128x1xf32, #tpu.memory_space<vmem>>, %arg3: memref<2x32xf32, #tpu.memory_space<vmem>>, %arg4: memref<128x32xbf16, #tpu.memory_space<vmem>>, %arg5: memref<32x128xbf16, #tpu.memory_space<vmem>>, %arg6: memref<128x1xf32, #tpu.memory_space<vmem>>, %arg7: memref<2x32xf32, #tpu.memory_space<vmem>>, %arg8: memref<128x128xbf16, #tpu.memory_space<vmem>>, %arg9: memref<1x128xf32, #tpu.memory_space<vmem>>, %arg10: memref<128x128xf32, #tpu.memory_space<vmem>>, %arg11: memref<128x128xf32, #tpu.memory_space<vmem>>, %arg12: memref<1x128xf32, #tpu.memory_space<vmem>>, %arg13: memref<4x128x128xbf16, #tpu.memory_space<vmem>>, %arg14: memref<128x128xbf16, #tpu.memory_space<vmem>>, %arg15: memref<2x128xf32, #tpu.memory_space<vmem>>) attributes {dimension_semantics = [], scalar_prefetch = 0 : i64, scratch_operands = 0 : i64, tpu.core_type = #tpu.core_type<tc>} {
    %c0 = arith.constant 0 : index
    %c0_0 = arith.constant 0 : index
    %0 = vector.load %arg1[%c0, %c0_0] : memref<32x128xbf16, #tpu.memory_space<vmem>>, vector<32x128xbf16>
    %c0_1 = arith.constant 0 : index
    %c0_2 = arith.constant 0 : index
    %1 = vector.load %arg14[%c0_1, %c0_2] : memref<128x128xbf16, #tpu.memory_space<vmem>>, vector<128x128xbf16>
    %cst = arith.constant dense<0.000000e+00> : vector<32x128xf32>
    %2 = tpu.matmul %0, %1, %cst {dimension_numbers = #tpu.dot_dimension_numbers<[1], [0], [0], [1], [0, 0, 1, 1], [], []>} : vector<32x128xbf16>, vector<128x128xbf16>, vector<32x128xf32> -> vector<32x128xf32>
    %c0_3 = arith.constant 0 : index
    %c0_4 = arith.constant 0 : index
    %3 = vector.load %arg0[%c0_3, %c0_4] : memref<128x32xbf16, #tpu.memory_space<vmem>>, vector<128x32xbf16>
    %cst_5 = arith.constant dense<0.000000e+00> : vector<128x128xf32>
    %4 = tpu.matmul %3, %0, %cst_5 {dimension_numbers = #tpu.dot_dimension_numbers<[1], [0], [0], [1], [0, 0, 1, 1], [], []>} : vector<128x32xbf16>, vector<32x128xbf16>, vector<128x128xf32> -> vector<128x128xf32>
    %c0_6 = arith.constant 0 : index
    %c0_7 = arith.constant 0 : index
    %5 = vector.load %arg2[%c0_6, %c0_7] : memref<128x1xf32, #tpu.memory_space<vmem>>, vector<128x1xf32>
    %6 = vector.broadcast %5 : vector<128x1xf32> to vector<128x128xf32>
    %7 = arith.mulf %4, %6 : vector<128x128xf32>
    %8 = arith.truncf %7 : vector<128x128xf32> to vector<128x128xbf16>
    %9 = vector.extract_strided_slice %8 {offsets = [0, 0], sizes = [32, 128], strides = [1, 1]} : vector<128x128xbf16> to vector<32x128xbf16>
    %c0_8 = arith.constant 0 : index
    %c0_9 = arith.constant 0 : index
    %c0_10 = arith.constant 0 : index
    %10 = vector.load %arg13[%c0_8, %c0_9, %c0_10] : memref<4x128x128xbf16, #tpu.memory_space<vmem>>, vector<1x128x128xbf16>
    %11 = vector.shape_cast %10 : vector<1x128x128xbf16> to vector<128x128xbf16>
    %cst_11 = arith.constant dense<0.000000e+00> : vector<32x128xf32>
    %12 = tpu.matmul %9, %11, %cst_11 {dimension_numbers = #tpu.dot_dimension_numbers<[1], [0], [0], [1], [0, 0, 1, 1], [], []>} : vector<32x128xbf16>, vector<128x128xbf16>, vector<32x128xf32> -> vector<32x128xf32>
    %13 = arith.addf %2, %12 : vector<32x128xf32>
    %14 = vector.extract_strided_slice %8 {offsets = [32, 0], sizes = [32, 128], strides = [1, 1]} : vector<128x128xbf16> to vector<32x128xbf16>
    %c1 = arith.constant 1 : index
    %c0_12 = arith.constant 0 : index
    %c0_13 = arith.constant 0 : index
    %15 = vector.load %arg13[%c1, %c0_12, %c0_13] : memref<4x128x128xbf16, #tpu.memory_space<vmem>>, vector<1x128x128xbf16>
    %16 = vector.shape_cast %15 : vector<1x128x128xbf16> to vector<128x128xbf16>
    %cst_14 = arith.constant dense<0.000000e+00> : vector<32x128xf32>
    %17 = tpu.matmul %14, %16, %cst_14 {dimension_numbers = #tpu.dot_dimension_numbers<[1], [0], [0], [1], [0, 0, 1, 1], [], []>} : vector<32x128xbf16>, vector<128x128xbf16>, vector<32x128xf32> -> vector<32x128xf32>
    %18 = arith.addf %13, %17 : vector<32x128xf32>
    %19 = vector.extract_strided_slice %8 {offsets = [64, 0], sizes = [32, 128], strides = [1, 1]} : vector<128x128xbf16> to vector<32x128xbf16>
    %c2 = arith.constant 2 : index
    %c0_15 = arith.constant 0 : index
    %c0_16 = arith.constant 0 : index
    %20 = vector.load %arg13[%c2, %c0_15, %c0_16] : memref<4x128x128xbf16, #tpu.memory_space<vmem>>, vector<1x128x128xbf16>
    %21 = vector.shape_cast %20 : vector<1x128x128xbf16> to vector<128x128xbf16>
    %cst_17 = arith.constant dense<0.000000e+00> : vector<32x128xf32>
    %22 = tpu.matmul %19, %21, %cst_17 {dimension_numbers = #tpu.dot_dimension_numbers<[1], [0], [0], [1], [0, 0, 1, 1], [], []>} : vector<32x128xbf16>, vector<128x128xbf16>, vector<32x128xf32> -> vector<32x128xf32>
    %23 = arith.addf %18, %22 : vector<32x128xf32>
    %24 = vector.extract_strided_slice %8 {offsets = [96, 0], sizes = [32, 128], strides = [1, 1]} : vector<128x128xbf16> to vector<32x128xbf16>
    %c3 = arith.constant 3 : index
    %c0_18 = arith.constant 0 : index
    %c0_19 = arith.constant 0 : index
    %25 = vector.load %arg13[%c3, %c0_18, %c0_19] : memref<4x128x128xbf16, #tpu.memory_space<vmem>>, vector<1x128x128xbf16>
    %26 = vector.shape_cast %25 : vector<1x128x128xbf16> to vector<128x128xbf16>
    %cst_20 = arith.constant dense<0.000000e+00> : vector<32x128xf32>
    %27 = tpu.matmul %24, %26, %cst_20 {dimension_numbers = #tpu.dot_dimension_numbers<[1], [0], [0], [1], [0, 0, 1, 1], [], []>} : vector<32x128xbf16>, vector<128x128xbf16>, vector<32x128xf32> -> vector<32x128xf32>
    %28 = arith.addf %23, %27 : vector<32x128xf32>
    %cst_21 = arith.constant 0.000000e+00 : f32
    %29 = vector.broadcast %cst_21 : f32 to vector<32x128xf32>
    %30 = arith.maximumf %28, %29 : vector<32x128xf32>
    %31 = arith.truncf %30 : vector<32x128xf32> to vector<32x128xbf16>
    %c0_22 = arith.constant 0 : index
    %c0_23 = arith.constant 0 : index
    %32 = vector.load %arg8[%c0_22, %c0_23] : memref<128x128xbf16, #tpu.memory_space<vmem>>, vector<128x128xbf16>
    %cst_24 = arith.constant dense<0.000000e+00> : vector<32x128xf32>
    %33 = tpu.matmul %31, %32, %cst_24 {dimension_numbers = #tpu.dot_dimension_numbers<[1], [0], [0], [1], [0, 0, 1, 1], [], []>} : vector<32x128xbf16>, vector<128x128xbf16>, vector<32x128xf32> -> vector<32x128xf32>
    %c0_25 = arith.constant 0 : index
    %c0_26 = arith.constant 0 : index
    %34 = vector.load %arg9[%c0_25, %c0_26] : memref<1x128xf32, #tpu.memory_space<vmem>>, vector<1x128xf32>
    %35 = vector.broadcast %34 : vector<1x128xf32> to vector<32x128xf32>
    %36 = arith.addf %33, %35 : vector<32x128xf32>
    %c0_27 = arith.constant 0 : index
    %c0_28 = arith.constant 0 : index
    %37 = vector.load %arg3[%c0_27, %c0_28] : memref<2x32xf32, #tpu.memory_space<vmem>>, vector<2x32xf32>
    %cst_29 = arith.constant dense<0.000000e+00> : vector<2x128xf32>
    %38 = tpu.matmul %37, %36, %cst_29 {dimension_numbers = #tpu.dot_dimension_numbers<[1], [0], [0], [1], [0, 0, 1, 1], [], []>} : vector<2x32xf32>, vector<32x128xf32>, vector<2x128xf32> -> vector<2x128xf32>
    %c0_30 = arith.constant 0 : index
    %c0_31 = arith.constant 0 : index
    %39 = vector.load %arg5[%c0_30, %c0_31] : memref<32x128xbf16, #tpu.memory_space<vmem>>, vector<32x128xbf16>
    %c0_32 = arith.constant 0 : index
    %c0_33 = arith.constant 0 : index
    %40 = vector.load %arg14[%c0_32, %c0_33] : memref<128x128xbf16, #tpu.memory_space<vmem>>, vector<128x128xbf16>
    %cst_34 = arith.constant dense<0.000000e+00> : vector<32x128xf32>
    %41 = tpu.matmul %39, %40, %cst_34 {dimension_numbers = #tpu.dot_dimension_numbers<[1], [0], [0], [1], [0, 0, 1, 1], [], []>} : vector<32x128xbf16>, vector<128x128xbf16>, vector<32x128xf32> -> vector<32x128xf32>
    %c0_35 = arith.constant 0 : index
    %c0_36 = arith.constant 0 : index
    %42 = vector.load %arg4[%c0_35, %c0_36] : memref<128x32xbf16, #tpu.memory_space<vmem>>, vector<128x32xbf16>
    %cst_37 = arith.constant dense<0.000000e+00> : vector<128x128xf32>
    %43 = tpu.matmul %42, %39, %cst_37 {dimension_numbers = #tpu.dot_dimension_numbers<[1], [0], [0], [1], [0, 0, 1, 1], [], []>} : vector<128x32xbf16>, vector<32x128xbf16>, vector<128x128xf32> -> vector<128x128xf32>
    %c0_38 = arith.constant 0 : index
    %c0_39 = arith.constant 0 : index
    %44 = vector.load %arg6[%c0_38, %c0_39] : memref<128x1xf32, #tpu.memory_space<vmem>>, vector<128x1xf32>
    %45 = vector.broadcast %44 : vector<128x1xf32> to vector<128x128xf32>
    %46 = arith.mulf %43, %45 : vector<128x128xf32>
    %47 = arith.truncf %46 : vector<128x128xf32> to vector<128x128xbf16>
    %48 = vector.extract_strided_slice %47 {offsets = [0, 0], sizes = [32, 128], strides = [1, 1]} : vector<128x128xbf16> to vector<32x128xbf16>
    %c0_40 = arith.constant 0 : index
    %c0_41 = arith.constant 0 : index
    %c0_42 = arith.constant 0 : index
    %49 = vector.load %arg13[%c0_40, %c0_41, %c0_42] : memref<4x128x128xbf16, #tpu.memory_space<vmem>>, vector<1x128x128xbf16>
    %50 = vector.shape_cast %49 : vector<1x128x128xbf16> to vector<128x128xbf16>
    %cst_43 = arith.constant dense<0.000000e+00> : vector<32x128xf32>
    %51 = tpu.matmul %48, %50, %cst_43 {dimension_numbers = #tpu.dot_dimension_numbers<[1], [0], [0], [1], [0, 0, 1, 1], [], []>} : vector<32x128xbf16>, vector<128x128xbf16>, vector<32x128xf32> -> vector<32x128xf32>
    %52 = arith.addf %41, %51 : vector<32x128xf32>
    %53 = vector.extract_strided_slice %47 {offsets = [32, 0], sizes = [32, 128], strides = [1, 1]} : vector<128x128xbf16> to vector<32x128xbf16>
    %c1_44 = arith.constant 1 : index
    %c0_45 = arith.constant 0 : index
    %c0_46 = arith.constant 0 : index
    %54 = vector.load %arg13[%c1_44, %c0_45, %c0_46] : memref<4x128x128xbf16, #tpu.memory_space<vmem>>, vector<1x128x128xbf16>
    %55 = vector.shape_cast %54 : vector<1x128x128xbf16> to vector<128x128xbf16>
    %cst_47 = arith.constant dense<0.000000e+00> : vector<32x128xf32>
    %56 = tpu.matmul %53, %55, %cst_47 {dimension_numbers = #tpu.dot_dimension_numbers<[1], [0], [0], [1], [0, 0, 1, 1], [], []>} : vector<32x128xbf16>, vector<128x128xbf16>, vector<32x128xf32> -> vector<32x128xf32>
    %57 = arith.addf %52, %56 : vector<32x128xf32>
    %58 = vector.extract_strided_slice %47 {offsets = [64, 0], sizes = [32, 128], strides = [1, 1]} : vector<128x128xbf16> to vector<32x128xbf16>
    %c2_48 = arith.constant 2 : index
    %c0_49 = arith.constant 0 : index
    %c0_50 = arith.constant 0 : index
    %59 = vector.load %arg13[%c2_48, %c0_49, %c0_50] : memref<4x128x128xbf16, #tpu.memory_space<vmem>>, vector<1x128x128xbf16>
    %60 = vector.shape_cast %59 : vector<1x128x128xbf16> to vector<128x128xbf16>
    %cst_51 = arith.constant dense<0.000000e+00> : vector<32x128xf32>
    %61 = tpu.matmul %58, %60, %cst_51 {dimension_numbers = #tpu.dot_dimension_numbers<[1], [0], [0], [1], [0, 0, 1, 1], [], []>} : vector<32x128xbf16>, vector<128x128xbf16>, vector<32x128xf32> -> vector<32x128xf32>
    %62 = arith.addf %57, %61 : vector<32x128xf32>
    %63 = vector.extract_strided_slice %47 {offsets = [96, 0], sizes = [32, 128], strides = [1, 1]} : vector<128x128xbf16> to vector<32x128xbf16>
    %c3_52 = arith.constant 3 : index
    %c0_53 = arith.constant 0 : index
    %c0_54 = arith.constant 0 : index
    %64 = vector.load %arg13[%c3_52, %c0_53, %c0_54] : memref<4x128x128xbf16, #tpu.memory_space<vmem>>, vector<1x128x128xbf16>
    %65 = vector.shape_cast %64 : vector<1x128x128xbf16> to vector<128x128xbf16>
    %cst_55 = arith.constant dense<0.000000e+00> : vector<32x128xf32>
    %66 = tpu.matmul %63, %65, %cst_55 {dimension_numbers = #tpu.dot_dimension_numbers<[1], [0], [0], [1], [0, 0, 1, 1], [], []>} : vector<32x128xbf16>, vector<128x128xbf16>, vector<32x128xf32> -> vector<32x128xf32>
    %67 = arith.addf %62, %66 : vector<32x128xf32>
    %cst_56 = arith.constant 0.000000e+00 : f32
    %68 = vector.broadcast %cst_56 : f32 to vector<32x128xf32>
    %69 = arith.maximumf %67, %68 : vector<32x128xf32>
    %70 = arith.truncf %69 : vector<32x128xf32> to vector<32x128xbf16>
    %c0_57 = arith.constant 0 : index
    %c0_58 = arith.constant 0 : index
    %71 = vector.load %arg8[%c0_57, %c0_58] : memref<128x128xbf16, #tpu.memory_space<vmem>>, vector<128x128xbf16>
    %cst_59 = arith.constant dense<0.000000e+00> : vector<32x128xf32>
    %72 = tpu.matmul %70, %71, %cst_59 {dimension_numbers = #tpu.dot_dimension_numbers<[1], [0], [0], [1], [0, 0, 1, 1], [], []>} : vector<32x128xbf16>, vector<128x128xbf16>, vector<32x128xf32> -> vector<32x128xf32>
    %c0_60 = arith.constant 0 : index
    %c0_61 = arith.constant 0 : index
    %73 = vector.load %arg9[%c0_60, %c0_61] : memref<1x128xf32, #tpu.memory_space<vmem>>, vector<1x128xf32>
    %74 = vector.broadcast %73 : vector<1x128xf32> to vector<32x128xf32>
    %75 = arith.addf %72, %74 : vector<32x128xf32>
    %c0_62 = arith.constant 0 : index
    %c0_63 = arith.constant 0 : index
    %76 = vector.load %arg7[%c0_62, %c0_63] : memref<2x32xf32, #tpu.memory_space<vmem>>, vector<2x32xf32>
    %cst_64 = arith.constant dense<0.000000e+00> : vector<2x128xf32>
    %77 = tpu.matmul %76, %75, %cst_64 {dimension_numbers = #tpu.dot_dimension_numbers<[1], [0], [0], [1], [0, 0, 1, 1], [], []>} : vector<2x32xf32>, vector<32x128xf32>, vector<2x128xf32> -> vector<2x128xf32>
    %c0_65 = arith.constant 0 : index
    %c0_66 = arith.constant 0 : index
    %78 = vector.load %arg10[%c0_65, %c0_66] : memref<128x128xf32, #tpu.memory_space<vmem>>, vector<128x128xf32>
    %cst_67 = arith.constant dense<0.000000e+00> : vector<2x128xf32>
    %79 = tpu.matmul %38, %78, %cst_67 {dimension_numbers = #tpu.dot_dimension_numbers<[1], [0], [0], [1], [0, 0, 1, 1], [], []>} : vector<2x128xf32>, vector<128x128xf32>, vector<2x128xf32> -> vector<2x128xf32>
    %c0_68 = arith.constant 0 : index
    %c0_69 = arith.constant 0 : index
    %80 = vector.load %arg11[%c0_68, %c0_69] : memref<128x128xf32, #tpu.memory_space<vmem>>, vector<128x128xf32>
    %cst_70 = arith.constant dense<0.000000e+00> : vector<2x128xf32>
    %81 = tpu.matmul %77, %80, %cst_70 {dimension_numbers = #tpu.dot_dimension_numbers<[1], [0], [0], [1], [0, 0, 1, 1], [], []>} : vector<2x128xf32>, vector<128x128xf32>, vector<2x128xf32> -> vector<2x128xf32>
    %82 = arith.addf %79, %81 : vector<2x128xf32>
    %c0_71 = arith.constant 0 : index
    %c0_72 = arith.constant 0 : index
    %83 = vector.load %arg12[%c0_71, %c0_72] : memref<1x128xf32, #tpu.memory_space<vmem>>, vector<1x128xf32>
    %84 = vector.broadcast %83 : vector<1x128xf32> to vector<2x128xf32>
    %85 = arith.addf %82, %84 : vector<2x128xf32>
    %c0_73 = arith.constant 0 : index
    %c0_74 = arith.constant 0 : index
    %86 = vector.load %arg15[%c0_73, %c0_74] : memref<2x128xf32, #tpu.memory_space<vmem>>, vector<2x128xf32>
    tpu.vector_store %arg15[%c0_73, %c0_74], %85 {strides = array<i32>} : memref<2x128xf32, #tpu.memory_space<vmem>>, vector<2x128xf32>,
    return
  }
}

</mosaic_0001>

<bundles_post_ra>
// kernel: dialog_discriminator_forward.1
= control target key start
LH: loop header
LB: loop body
LE: loop exit
PB: predicated region body
PF: predicated region fallthrough
CT: control target
= control target key end

     0   :  { %v2887_v1 = vmov 0   ;;  %vm139_vm0 = vcmask 261120   ;;  %vm2889_vm1 = vmmov 0   ;;  %s3812_s1 = inlined_call_operand.vmem [shape: bf16[32,128], index: 1, kind: input, shape index: {}]   ;;  %s3813_s0 = inlined_call_operand.vmem [shape: bf16[128,32], index: 0, kind: input, shape index: {}]   ;;  %s3814_s2 = inlined_call_operand.vmem [shape: f32[128,1], index: 2, kind: input, shape index: {}]   ;;  %s3815_s6 = inlined_call_operand.vmem [shape: f32[128,1], index: 6, kind: input, shape index: {}]   ;;  %s3816_s13 = inlined_call_operand.vmem [shape: bf16[4,128,128], index: 13, kind: input, shape index: {}]   ;;  %s3817_s14 = inlined_call_operand.vmem [shape: bf16[128,128], index: 14, kind: input, shape index: {}]   ;;  %s3818_s8 = inlined_call_operand.vmem [shape: bf16[128,128], index: 8, kind: input, shape index: {}]   ;;  %s3819_s5 = inlined_call_operand.vmem [shape: bf16[32,128], index: 5, kind: input, shape index: {}]   ;;  %s3820_s4 = inlined_call_operand.vmem [shape: bf16[128,32], index: 4, kind: input, shape index: {}]   ;;  %s3821_s9 = inlined_call_operand.vmem [shape: f32[1,128], index: 9, kind: input, shape index: {}]   ;;  %s3822_s3 = inlined_call_operand.vmem [shape: f32[2,32], index: 3, kind: input, shape index: {}]   ;;  %s3823_s10 = inlined_call_operand.vmem [shape: f32[128,128], index: 10, kind: input, shape index: {}]   ;;  %s3824_s11 = inlined_call_operand.vmem [shape: f32[128,128], index: 11, kind: input, shape index: {}]   ;;  %s3825_s7 = inlined_call_operand.vmem [shape: f32[2,32], index: 7, kind: input, shape index: {}]   ;;  %s3826_s12 = inlined_call_operand.vmem [shape: f32[1,128], index: 12, kind: input, shape index: {}]   ;;  %s3827_s15 = inlined_call_operand.vmem [shape: f32[2,128], index: 15, kind: output, shape index: {}]  }
   0x1   :  { %v2974_v0 = vld [vmem:[%s3812_s1] sm:$0xff]   ;;  %2817 = vset.pattern.permute.xlu0 %v2887_v1  ;;  %2818 = vset.pattern.permute.xlu1 %v2887_v1  ;;  %v2979_v2 = vld [vmem:[%s3812_s1 + $0x8] sm:$0xff]   ;;  %v2823_v5 = vld [vmem:[%s3813_s0 + $0x10] sm:$0xff]  }
   0x2   :  { %2349 = vmatprep.subr.bf16.mxu1 %v2974_v0  ;;  %v2821_v3 = vld [vmem:[%s3813_s0] sm:$0xff]   ;;  %v2822_v4 = vld [vmem:[%s3813_s0 + $0x8] sm:$0xff]   ;;  %v263_v7 = vld [vmem:[%s3814_s2 + $0x10] sm:$0xff] }
   0x3   :  { %2350 = vmatpush3.bf16.msra.mxu1 %v2974_v0  ;;  %2353 = vmatprep.mubr.msk.bf16.mxu1 %vm139_vm0, %v2821_v3  ;;  %v261_v6 = vld [vmem:[%s3814_s2] sm:$0xff]  ;;  %v262_v8 = vld [vmem:[%s3814_s2 + $0x8] sm:$0xff]  ;;  %v264_v9 = vld [vmem:[%s3814_s2 + $0x18] sm:$0xff] }
   0x4   :  { %2351 = vmatprep.subr.bf16.mxu1 %v2979_v2  ;;  %279 = vperm.xlu0 %2817, %v261_v6   ;;  %v2824_v10 = vld [vmem:[%s3813_s0 + $0x18] sm:$0xff]   ;;  %v265_v11 = vld [vmem:[%s3814_s2 + $0x20] sm:$0xff]  ;;  %v266_v13 = vld [vmem:[%s3814_s2 + $0x28] sm:$0xff] }
   0x5   :  { %289 = vperm.xlu1 %2818, %v263_v7   ;;  %v2825_v12 = vld [vmem:[%s3813_s0 + $0x20] sm:$0xff]   ;;  %v267_v14 = vld [vmem:[%s3814_s2 + $0x30] sm:$0xff]  ;;  %v268_v15 = vld [vmem:[%s3814_s2 + $0x38] sm:$0xff] }
   0x6   :  { %v2826_v16 = vld [vmem:[%s3813_s0 + $0x28] sm:$0xff]   ;;  %v269_v17 = vld [vmem:[%s3814_s2 + $0x40] sm:$0xff]  ;;  %v2827_v18 = vld [vmem:[%s3813_s0 + $0x30] sm:$0xff]  }
   0x7   :  { %2352 = vmatpush3.bf16.msra.mxu1 %v2979_v2  ;;  %v270_v19 = vld [vmem:[%s3814_s2 + $0x48] sm:$0xff]  ;;  %v271_v20 = vld [vmem:[%s3814_s2 + $0x50] sm:$0xff]  ;;  %v272_v21 = vld [vmem:[%s3814_s2 + $0x58] sm:$0xff] }
   0x8   :  { %284 = vperm.xlu0 %2817, %v262_v8   ;;  %v2828_v22 = vld [vmem:[%s3813_s0 + $0x38] sm:$0xff]   ;;  %v273_v23 = vld [vmem:[%s3814_s2 + $0x60] sm:$0xff]  ;;  %v274_v24 = vld [vmem:[%s3814_s2 + $0x68] sm:$0xff] }
   0x9   :  { %294 = vperm.xlu1 %2818, %v264_v9   ;;  %v275_v25 = vld [vmem:[%s3814_s2 + $0x70] sm:$0xff]  ;;  %v276_v26 = vld [vmem:[%s3814_s2 + $0x78] sm:$0xff]  ;;  %v1338_v27 = vld [vmem:[%s3815_s6] sm:$0xff] }
   0xa   :  { %2354 = vmatmul.mubr.msk.bf16.vlgmr.msra.gmra.mrb[0].mxu1 %vm139_vm0, %v2822_v4  ;;  %v1339_v28 = vld [vmem:[%s3815_s6 + $0x8] sm:$0xff]  ;;  %v1340_v29 = vld [vmem:[%s3815_s6 + $0x10] sm:$0xff]  ;;  %v1341_v30 = vld [vmem:[%s3815_s6 + $0x18] sm:$0xff] }
   0xb   :  { %2357 = vmatprep.mubr.msk.bf16.mxu1 %vm139_vm0, %v2823_v5  ;;  %v1342_v31 = vld [vmem:[%s3815_s6 + $0x20] sm:$0xff]  ;;  %v1343_v32 = vld [vmem:[%s3815_s6 + $0x28] sm:$0xff]  ;;  %v1344_v34 = vld [vmem:[%s3815_s6 + $0x30] sm:$0xff] }
   0xc   :  { %299 = vperm.xlu0 %2817, %v265_v11   ;;  %v3086_v33 = vld [vmem:[%s3816_s13] sm:$0xff]   ;;  %v1345_v35 = vld [vmem:[%s3815_s6 + $0x38] sm:$0xff]  ;;  %v3099_v36 = vld [vmem:[%s3816_s13 + $0x8] sm:$0xff]  }
   0xd   :  { %304 = vperm.xlu1 %2818, %v266_v13   ;;  %2369 = vmatprep.subr.bf16.mxu1 %v3086_v33  ;;  %v1346_v37 = vld [vmem:[%s3815_s6 + $0x40] sm:$0xff]  ;;  %v1347_v38 = vld [vmem:[%s3815_s6 + $0x48] sm:$0xff]  ;;  %v3112_v39 = vld [vmem:[%s3816_s13 + $0x10] sm:$0xff]  }
   0xe   :  { %2370 = vmatpush3.bf16.msra.mxu1 %v3086_v33  ;;  %v1348_v40 = vld [vmem:[%s3815_s6 + $0x50] sm:$0xff]  ;;  %v1349_v41 = vld [vmem:[%s3815_s6 + $0x58] sm:$0xff]  ;;  %v1350_v43 = vld [vmem:[%s3815_s6 + $0x60] sm:$0xff] }
   0xf   :  { %2371 = vmatprep.subr.bf16.mxu1 %v3099_v36  ;;  %v3125_v42 = vld [vmem:[%s3816_s13 + $0x18] sm:$0xff]   ;;  %v1351_v44 = vld [vmem:[%s3815_s6 + $0x68] sm:$0xff]  ;;  %v3138_v45 = vld [vmem:[%s3816_s13 + $0x20] sm:$0xff]  }
  0x10   :  { %309 = vperm.xlu0 %2817, %v267_v14   ;;  %v1352_v46 = vld [vmem:[%s3815_s6 + $0x70] sm:$0xff]  ;;  %v1353_v47 = vld [vmem:[%s3815_s6 + $0x78] sm:$0xff]  ;;  %v3151_v48 = vld [vmem:[%s3816_s13 + $0x28] sm:$0xff]  }
  0x11   :  { %314 = vperm.xlu1 %2818, %v268_v15   ;;  %v3158_v49 = vld [vmem:[%s3816_s13 + $0x30] sm:$0xff]   ;;  %v3165_v50 = vld [vmem:[%s3816_s13 + $0x38] sm:$0xff]   ;;  %v3172_v51 = vld [vmem:[%s3817_s14] sm:$0xff]  }
  0x12   :  { %2358 = vmatmul.mubr.msk.bf16.gmra.mrb[4].mxu1 %vm139_vm0, %v2824_v10  ;;  %v3178_v9 = vld [vmem:[%s3817_s14 + $0x8] sm:$0xff]   ;;  %v3183_v13 = vld [vmem:[%s3817_s14 + $0x10] sm:$0xff]   ;;  %v3190_v15 = vld [vmem:[%s3818_s8] sm:$0xff]  }
  0x13   :  { %2361 = vmatprep.mubr.msk.bf16.mxu1 %vm139_vm0, %v2825_v12  ;;  %2372 = vmatpush3.bf16.msra.mxu1 %v3099_v36 }
  0x14   :  { %319 = vperm.xlu0 %2817, %v269_v17   ;;  %2373 = vmatprep.subr.bf16.mxu1 %v3112_v39 }
  0x15   :  { %324 = vperm.xlu1 %2818, %v270_v19   ;;  %v3200_v19 = vld [vmem:[%s3818_s8 + $0x8] sm:$0xff]   ;;  %2469 = vmatprep.subr.bf16.mxu0 %v3190_v15 }
  0x16   :  { %2470 = vmatpush3.bf16.msra.mxu0 %v3190_v15 }
  0x17   :  { %2374 = vmatpush3.bf16.msra.mxu1 %v3112_v39  ;;  %2471 = vmatprep.subr.bf16.mxu0 %v3200_v19 }
  0x18   :  { %329 = vperm.xlu0 %2817, %v271_v20   ;;  %2375 = vmatprep.subr.bf16.mxu1 %v3125_v42 }
  0x19   :  { %334 = vperm.xlu1 %2818, %v272_v21  }
  0x1a   :  { %2362 = vmatmul.mubr.msk.bf16.gmra.mrb[8].mxu1 %vm139_vm0, %v2826_v16  ;;  %2472 = vmatpush3.bf16.msra.mxu0 %v3200_v19 }
  0x1b   :  { %2365 = vmatprep.mubr.msk.bf16.mxu1 %vm139_vm0, %v2827_v18  ;;  %2376 = vmatpush3.bf16.msra.mxu1 %v3125_v42 }
  0x1c   :  { %339 = vperm.xlu0 %2817, %v273_v23   ;;  %2377 = vmatprep.subr.bf16.mxu1 %v3138_v45 }
  0x1d   :  { %344 = vperm.xlu1 %2818, %v274_v24  }
  0x1f   :  { %2378 = vmatpush3.bf16.msra.mxu1 %v3138_v45 }
  0x20   :  { %349 = vperm.xlu0 %2817, %v275_v25   ;;  %2379 = vmatprep.subr.bf16.mxu1 %v3151_v48  ;;  %v3217_v25 = vld [vmem:[%s3818_s8 + $0x10] sm:$0xff]  }
  0x21   :  { %354 = vperm.xlu1 %2818, %v276_v26   ;;  %v3223_v26 = vld [vmem:[%s3817_s14 + $0x18] sm:$0xff]   ;;  %2473 = vmatprep.subr.bf16.mxu0 %v3217_v25 }
  0x22   :  { %2366 = vmatmul.mubr.msk.bf16.gmra.mrb[12].mxu1 %vm139_vm0, %v2828_v22  ;;  %2474 = vmatpush3.bf16.msra.mxu0 %v3217_v25 }
  0x23   :  { %2380 = vmatpush3.bf16.msra.mxu1 %v3151_v48 }
  0x24   :  { %1356 = vperm.xlu0 %2817, %v1338_v27   ;;  %2381 = vmatprep.subr.bf16.mxu1 %v3158_v49 }
  0x25   :  { %1361 = vperm.xlu1 %2818, %v1339_v28  }
  0x27   :  { %2382 = vmatpush3.bf16.msra.mxu1 %v3158_v49 }
  0x28   :  { %1366 = vperm.xlu0 %2817, %v1340_v29   ;;  %2383 = vmatprep.subr.bf16.mxu1 %v3165_v50 }
  0x29   :  { %1371 = vperm.xlu1 %2818, %v1341_v30   ;;  %v3231_v30 = vld [vmem:[%s3818_s8 + $0x18] sm:$0xff]  }
  0x2a   :  { %2475 = vmatprep.subr.bf16.mxu0 %v3231_v30 }
  0x2b   :  { %2384 = vmatpush3.bf16.msra.mxu1 %v3165_v50  ;;  %2476 = vmatpush3.bf16.msra.mxu0 %v3231_v30 }
  0x2c   :  { %1376 = vperm.xlu0 %2817, %v1342_v31   ;;  %2389 = vmatprep.subr.bf16.mxu1 %v3172_v51 }
  0x2d   :  { %1381 = vperm.xlu1 %2818, %v1343_v32  }
  0x30   :  { %1386 = vperm.xlu0 %2817, %v1344_v34  }
  0x31   :  { %1391 = vperm.xlu1 %2818, %v1345_v35  }
  0x34   :  { %1396 = vperm.xlu0 %2817, %v1346_v37   ;;  %v3241_v37 = vld [vmem:[%s3817_s14 + $0x20] sm:$0xff]  }
  0x35   :  { %1401 = vperm.xlu1 %2818, %v1347_v38  }
  0x38   :  { %1406 = vperm.xlu0 %2817, %v1348_v40  }
  0x39   :  { %1411 = vperm.xlu1 %2818, %v1349_v41  }
  0x3c   :  { %1416 = vperm.xlu0 %2817, %v1350_v43  }
  0x3d   :  { %1421 = vperm.xlu1 %2818, %v1351_v44  }
  0x40   :  { %1426 = vperm.xlu0 %2817, %v1352_v46   ;;  %v3257_v46 = vld [vmem:[%s3818_s8 + $0x20] sm:$0xff]  }
  0x41   :  { %1431 = vperm.xlu1 %2818, %v1353_v47   ;;  %v3263_v47 = vld [vmem:[%s3817_s14 + $0x28] sm:$0xff]   ;;  %2477 = vmatprep.subr.bf16.mxu0 %v3257_v46 }
  0x42   :  { %2478 = vmatpush3.bf16.msra.mxu0 %v3257_v46 }
  0x83   :  { %v280_v52 = vpop.permute.xlu0 %279 }
  0x84   :  { %v290_v53 = vpop.permute.xlu1 %289 }
  0x87   :  { %v285_v54 = vpop.permute.xlu0 %284 }
  0x88   :  { %v295_v55 = vpop.permute.xlu1 %294 }
  0x8b   :  { %v300_v56 = vpop.permute.xlu0 %299 }
  0x8c   :  { %v305_v57 = vpop.permute.xlu1 %304 }
  0x8f   :  { %v310_v59 = vpop.permute.xlu0 %309 }
  0x90   :  { %v315_v61 = vpop.permute.xlu1 %314 }
  0x93   :  { %v320_v8 = vpop.permute.xlu0 %319 }
  0x94   :  { %v325_v10 = vpop.permute.xlu1 %324 }
  0x97   :  { %v330_v21 = vpop.permute.xlu0 %329 }
  0x98   :  { %v335_v23 = vpop.permute.xlu1 %334 }
  0x9b   :  { %v340_v31 = vpop.permute.xlu0 %339 }
  0x9c   :  { %v345_v38 = vpop.permute.xlu1 %344 }
  0xdd   :  { %v2355_v58 = vpop.f32.mrb[0].mxu1 }
  0xde   :  { %v198_v60 = vpop.f32.mrb[1].mxu1  ;;  %v359_v63 = vmul.f32 %v2355_v58, %v290_v53  ;;  %v350_v53 = vpop.permute.xlu0 %349 }
  0xdf   :  { %v2356_v62 = vpop.f32.mrb[2].mxu1  ;;  %v357_v4 = vmul.f32 %v280_v52, %v198_v60 }
  0xe0   :  { %v360_v1 = vmul.f32 %v2356_v62, %v295_v55  ;;  %v201_v3 = vpop.f32.mrb[3].mxu1  ;;  %v355_v55 = vpop.permute.xlu1 %354 }
  0xe1   :  { %v358_v5 = vmul.f32 %v285_v54, %v201_v3 }
  0xe2   :  { %v374_v6 = vpack.c.bf16 %v360_v1, %v359_v63 }
  0xe3   :  { %v373_v7 = vpack.c.bf16 %v358_v5, %v357_v4  ;;  %v3298_v4 = vld [vmem:[%s3817_s14 + $0x38] sm:$0xff]   ;;  %v3306_v5 = vld [vmem:[%s3816_s13 + $0x40] sm:$0xff]  }
  0xe5   :  { %v2359_v11 = vpop.f32.mrb[4].mxu1  ;;  %2385 = vmatprep.mubr.bf16.mxu1 %v373_v7  ;;  %v3321_v7 = vld [vmem:[%s3816_s13 + $0x50] sm:$0xff]  }
  0xe6   :  { %v214_v12 = vpop.f32.mrb[5].mxu1  ;;  %2386 = vmatmul.mubr.bf16.vlgmr.msra.gmra.mrb[16].mxu1 %v374_v6  ;;  %v3192_v16 = vmul.f32 %v2359_v11, %v310_v59  ;;  %v3313_v6 = vld [vmem:[%s3816_s13 + $0x48] sm:$0xff]   ;;  %v3349_v11 = vld [vmem:[%s3816_s13 + $0x70] sm:$0xff]  }
  0xe7   :  { %2390 = vmatpush3.bf16.msra.mxu1 %v3172_v51  ;;  %v2360_v14 = vpop.f32.mrb[6].mxu1  ;;  %2405 = vmatprep.mubr.bf16.mxu1 %v2974_v0  ;;  %v3202_v20 = vmul.f32 %v300_v56, %v214_v12  ;;  %v3356_v12 = vld [vmem:[%s3816_s13 + $0x78] sm:$0xff]  }
  0xe8   :  { %v3194_v17 = vmul.f32 %v2360_v14, %v315_v61  ;;  %v217_v18 = vpop.f32.mrb[7].mxu1  ;;  %2391 = vmatprep.subr.bf16.mxu1 %v3178_v9  ;;  %v3281_v61 = vld [vmem:[%s3817_s14 + $0x30] sm:$0xff]   ;;  %v3363_v14 = vld [vmem:[%s3816_s13 + $0x80] sm:$0xff]  }
  0xe9   :  { %v3204_v0 = vmul.f32 %v305_v57, %v217_v18  ;;  %v3271_v57 = vld [vmem:[%s3818_s8 + $0x28] sm:$0xff]  }
  0xea   :  { %v376_v22 = vpack.c.bf16 %v3194_v17, %v3192_v16  ;;  %2479 = vmatprep.subr.bf16.mxu0 %v3271_v57  ;;  %v3370_v18 = vld [vmem:[%s3816_s13 + $0x88] sm:$0xff]   ;;  %v3390_v16 = vld [vmem:[%s3816_s13 + $0x98] sm:$0xff]   ;;  %v3397_v17 = vld [vmem:[%s3816_s13 + $0xa0] sm:$0xff]  }
  0xeb   :  { %v375_v24 = vpack.c.bf16 %v3204_v0, %v3202_v20  ;;  %2392 = vmatpush3.bf16.msra.mxu1 %v3178_v9  ;;  %2480 = vmatpush3.bf16.msra.mxu0 %v3271_v57  ;;  %v3383_v20 = vld [vmem:[%s3816_s13 + $0x90] sm:$0xff]   ;;  %v3404_v0 = vld [vmem:[%s3816_s13 + $0xa8] sm:$0xff]  }
  0xec   :  { %2393 = vmatprep.subr.bf16.mxu1 %v3183_v13 }
  0xed   :  { %v2363_v27 = vpop.f32.mrb[8].mxu1 }
  0xee   :  { %v230_v28 = vpop.f32.mrb[9].mxu1  ;;  %v3233_v32 = vmul.f32 %v2363_v27, %v330_v21  ;;  %v3411_v21 = vld [vmem:[%s3816_s13 + $0xb0] sm:$0xff]  }
  0xef   :  { %2394 = vmatpush3.bf16.msra.mxu1 %v3183_v13  ;;  %v2364_v29 = vpop.f32.mrb[10].mxu1  ;;  %v3243_v40 = vmul.f32 %v320_v8, %v230_v28  ;;  %v3328_v8 = vld [vmem:[%s3816_s13 + $0x58] sm:$0xff]   ;;  %v3445_v27 = vld [vmem:[%s3816_s13 + $0xd0] sm:$0xff]  }
  0xf0   :  { %v3235_v34 = vmul.f32 %v2364_v29, %v335_v23  ;;  %v233_v35 = vpop.f32.mrb[11].mxu1  ;;  %2395 = vmatprep.subr.bf16.mxu1 %v3223_v26  ;;  %v3425_v23 = vld [vmem:[%s3816_s13 + $0xc0] sm:$0xff]   ;;  %v3452_v28 = vld [vmem:[%s3816_s13 + $0xd8] sm:$0xff]  }
  0xf1   :  { %v3245_v41 = vmul.f32 %v325_v10, %v233_v35  ;;  %v3342_v10 = vld [vmem:[%s3816_s13 + $0x68] sm:$0xff]   ;;  %v3459_v29 = vld [vmem:[%s3816_s13 + $0xe0] sm:$0xff]  }
  0xf2   :  { %v378_v43 = vpack.c.bf16 %v3235_v34, %v3233_v32  ;;  %v3473_v32 = vld [vmem:[%s3816_s13 + $0xf0] sm:$0xff]   ;;  %v3480_v34 = vld [vmem:[%s3816_s13 + $0xf8] sm:$0xff]  }
  0xf3   :  { %v377_v44 = vpack.c.bf16 %v3245_v41, %v3243_v40  ;;  %2396 = vmatpush3.bf16.msra.mxu1 %v3223_v26 }
  0xf4   :  { %2397 = vmatprep.subr.bf16.mxu1 %v3241_v37 }
  0xf5   :  { %v2367_v52 = vpop.f32.mrb[12].mxu1 }
  0xf6   :  { %v246_v54 = vpop.f32.mrb[13].mxu1  ;;  %v3273_v58 = vmul.f32 %v2367_v52, %v350_v53  ;;  %v2888_v53 = vmov 0.0|0.0  }
  0xf7   :  { %2398 = vmatpush3.bf16.msra.mxu1 %v3241_v37  ;;  %v2368_v56 = vpop.f32.mrb[14].mxu1  ;;  %v3283_v62 = vmul.f32 %v340_v31, %v246_v54  ;;  %v3466_v31 = vld [vmem:[%s3816_s13 + $0xe8] sm:$0xff]   ;;  %v2890_v54 = vmov 0.0  }
  0xf8   :  { %v3275_v59 = vmul.f32 %v2368_v56, %v355_v55  ;;  %v249_v60 = vpop.f32.mrb[15].mxu1  ;;  %2399 = vmatprep.subr.bf16.mxu1 %v3263_v47  ;;  %v3513_v56 = vld [vmem:[%s3821_s9] ss:$0 sm:$0xff] }
  0xf9   :  { %v3285_v63 = vmul.f32 %v345_v38, %v249_v60 }
  0xfa   :  { %v380_v1 = vpack.c.bf16 %v3275_v59, %v3273_v58 }
  0xfb   :  { %v379_v3 = vpack.c.bf16 %v3285_v63, %v3283_v62  ;;  %2400 = vmatpush3.bf16.msra.mxu1 %v3263_v47 }
  0xfc   :  { %2401 = vmatprep.subr.bf16.mxu1 %v3281_v61 }
  0xff   :  { %2402 = vmatpush3.bf16.msra.mxu1 %v3281_v61 }
 0x100   :  { %2403 = vmatprep.subr.bf16.mxu1 %v3298_v4 }
 0x103   :  { %2404 = vmatpush3.bf16.msra.mxu1 %v3298_v4 }
 0x104   :  { %2409 = vmatprep.subr.bf16.mxu1 %v3306_v5 }
 0x106   :  { %2406 = vmatmul.mubr.bf16.vlgmr.msra.gmra.mrb[16].mxu1 %v2979_v2  ;;  %v3335_v2 = vld [vmem:[%s3816_s13 + $0x60] sm:$0xff]  }
 0x107   :  { %2410 = vmatpush3.bf16.msra.mxu1 %v3306_v5  ;;  %2425 = vmatprep.mubr.bf16.mxu1 %v375_v24  ;;  %v3432_v24 = vld [vmem:[%s3816_s13 + $0xc8] sm:$0xff]  }
 0x108   :  { %2411 = vmatprep.subr.bf16.mxu1 %v3313_v6 }
 0x10b   :  { %2412 = vmatpush3.bf16.msra.mxu1 %v3313_v6 }
 0x10c   :  { %2413 = vmatprep.subr.bf16.mxu1 %v3321_v7 }
 0x10f   :  { %2414 = vmatpush3.bf16.msra.mxu1 %v3321_v7 }
 0x110   :  { %2415 = vmatprep.subr.bf16.mxu1 %v3328_v8 }
 0x113   :  { %2416 = vmatpush3.bf16.msra.mxu1 %v3328_v8 }
 0x114   :  { %2417 = vmatprep.subr.bf16.mxu1 %v3335_v2 }
 0x117   :  { %2418 = vmatpush3.bf16.msra.mxu1 %v3335_v2 }
 0x118   :  { %2419 = vmatprep.subr.bf16.mxu1 %v3342_v10 }
 0x11b   :  { %2420 = vmatpush3.bf16.msra.mxu1 %v3342_v10 }
 0x11c   :  { %2421 = vmatprep.subr.bf16.mxu1 %v3349_v11 }
 0x11f   :  { %2422 = vmatpush3.bf16.msra.mxu1 %v3349_v11 }
 0x120   :  { %2423 = vmatprep.subr.bf16.mxu1 %v3356_v12 }
 0x123   :  { %2424 = vmatpush3.bf16.msra.mxu1 %v3356_v12 }
 0x124   :  { %2429 = vmatprep.subr.bf16.mxu1 %v3363_v14 }
 0x126   :  { %2426 = vmatmul.mubr.bf16.vlgmr.msra.gmra.mrb[16].mxu1 %v376_v22  ;;  %v3418_v22 = vld [vmem:[%s3816_s13 + $0xb8] sm:$0xff]  }
 0x127   :  { %2430 = vmatpush3.bf16.msra.mxu1 %v3363_v14  ;;  %2445 = vmatprep.mubr.bf16.mxu1 %v377_v44 }
 0x128   :  { %2431 = vmatprep.subr.bf16.mxu1 %v3370_v18 }
 0x12b   :  { %2432 = vmatpush3.bf16.msra.mxu1 %v3370_v18 }
 0x12c   :  { %2433 = vmatprep.subr.bf16.mxu1 %v3383_v20 }
 0x12f   :  { %2434 = vmatpush3.bf16.msra.mxu1 %v3383_v20 }
 0x130   :  { %2435 = vmatprep.subr.bf16.mxu1 %v3390_v16 }
 0x133   :  { %2436 = vmatpush3.bf16.msra.mxu1 %v3390_v16 }
 0x134   :  { %2437 = vmatprep.subr.bf16.mxu1 %v3397_v17 }
 0x137   :  { %2438 = vmatpush3.bf16.msra.mxu1 %v3397_v17 }
 0x138   :  { %2439 = vmatprep.subr.bf16.mxu1 %v3404_v0 }
 0x13b   :  { %2440 = vmatpush3.bf16.msra.mxu1 %v3404_v0 }
 0x13c   :  { %2441 = vmatprep.subr.bf16.mxu1 %v3411_v21 }
 0x13f   :  { %2442 = vmatpush3.bf16.msra.mxu1 %v3411_v21 }
 0x140   :  { %2443 = vmatprep.subr.bf16.mxu1 %v3418_v22 }
 0x143   :  { %2444 = vmatpush3.bf16.msra.mxu1 %v3418_v22 }
 0x144   :  { %2449 = vmatprep.subr.bf16.mxu1 %v3425_v23 }
 0x146   :  { %2446 = vmatmul.mubr.bf16.vlgmr.msra.gmra.mrb[16].mxu1 %v378_v43 }
 0x147   :  { %2450 = vmatpush3.bf16.msra.mxu1 %v3425_v23  ;;  %2465 = vmatprep.mubr.bf16.mxu1 %v379_v3 }
 0x148   :  { %2451 = vmatprep.subr.bf16.mxu1 %v3432_v24 }
 0x14b   :  { %2452 = vmatpush3.bf16.msra.mxu1 %v3432_v24 }
 0x14c   :  { %2453 = vmatprep.subr.bf16.mxu1 %v3445_v27 }
 0x14f   :  { %2454 = vmatpush3.bf16.msra.mxu1 %v3445_v27 }
 0x150   :  { %2455 = vmatprep.subr.bf16.mxu1 %v3452_v28 }
 0x153   :  { %2456 = vmatpush3.bf16.msra.mxu1 %v3452_v28 }
 0x154   :  { %2457 = vmatprep.subr.bf16.mxu1 %v3459_v29 }
 0x157   :  { %2458 = vmatpush3.bf16.msra.mxu1 %v3459_v29 }
 0x158   :  { %2459 = vmatprep.subr.bf16.mxu1 %v3466_v31 }
 0x15b   :  { %2460 = vmatpush3.bf16.msra.mxu1 %v3466_v31 }
 0x15c   :  { %2461 = vmatprep.subr.bf16.mxu1 %v3473_v32 }
 0x15f   :  { %2462 = vmatpush3.bf16.msra.mxu1 %v3473_v32 }
 0x160   :  { %2463 = vmatprep.subr.bf16.mxu1 %v3480_v34 }
 0x163   :  { %2464 = vmatpush3.bf16.msra.mxu1 %v3480_v34 }
 0x164   :  { %2620 = vmatprep.subr.bf16.mxu1 %v3190_v15 }
 0x166   :  { %2466 = vmatmul.mubr.bf16.vlgmr.msra.gmra.mrb[16].mxu1 %v380_v1 }
 0x167   :  { %2621 = vmatpush3.bf16.msra.mxu1 %v3190_v15  ;;  %v2875_v15 = vld [vmem:[%s3818_s8 + $0x30] sm:$0xff]  }
 0x168   :  { %2622 = vmatprep.subr.bf16.mxu1 %v3200_v19  ;;  %2481 = vmatprep.subr.bf16.mxu0 %v2875_v15 }
 0x169   :  { %2482 = vmatpush3.bf16.msra.mxu0 %v2875_v15 }
 0x16b   :  { %2623 = vmatpush3.bf16.msra.mxu1 %v3200_v19  ;;  %v2876_v19 = vld [vmem:[%s3818_s8 + $0x38] sm:$0xff]  }
 0x16c   :  { %2624 = vmatprep.subr.bf16.mxu1 %v3217_v25  ;;  %2483 = vmatprep.subr.bf16.mxu0 %v2876_v19 }
 0x16d   :  { %2484 = vmatpush3.bf16.msra.mxu0 %v2876_v19 }
 0x16e   :  { %2721 = vmatprep.subr.bf16.mxu0 %v2888_v53 }
 0x16f   :  { %2625 = vmatpush3.bf16.msra.mxu1 %v3217_v25 }
 0x170   :  { %2626 = vmatprep.subr.bf16.mxu1 %v3231_v30 }
 0x173   :  { %2627 = vmatpush3.bf16.msra.mxu1 %v3231_v30 }
 0x174   :  { %2628 = vmatprep.subr.bf16.mxu1 %v3257_v46 }
 0x177   :  { %2629 = vmatpush3.bf16.msra.mxu1 %v3257_v46 }
 0x178   :  { %2630 = vmatprep.subr.bf16.mxu1 %v3271_v57 }
 0x17b   :  { %2631 = vmatpush3.bf16.msra.mxu1 %v3271_v57 }
 0x17c   :  { %2632 = vmatprep.subr.bf16.mxu1 %v2875_v15 }
 0x17f   :  { %2633 = vmatpush3.bf16.msra.mxu1 %v2875_v15 }
 0x180   :  { %2634 = vmatprep.subr.bf16.mxu1 %v2876_v19 }
 0x183   :  { %2635 = vmatpush3.bf16.msra.mxu1 %v2876_v19  ;;  %v3523_v19 = vld [vmem:[%s3819_s5] sm:$0xff]  }
 0x184   :  { %2727 = vmatprep.subr.bf16.mxu1 %v2888_v53 }
 0x239   :  { %v2467_v25 = vpop.f32.mrb[16].mxu1 }
 0x23a   :  { %v926_v30 = vpop.f32.mrb[17].mxu1  ;;  %v947_v38 = vmax.f32 %v2467_v25, 0.0  ;;  %v1071_v25 = vld [vmem:[%s3822_s3] sm:$0x3] }
 0x23b   :  { %v2468_v35 = vpop.f32.mrb[18].mxu1  ;;  %v945_v43 = vmax.f32 %v926_v30, 0.0  ;;  %v2879_v30 = vld [vmem:[%s3820_s4] sm:$0xff]  }
 0x23c   :  { %v948_v40 = vmax.f32 %v2468_v35, 0.0  ;;  %v929_v41 = vpop.f32.mrb[19].mxu1  ;;  %v3535_v35 = vld [vmem:[%s3819_s5 + $0x8] sm:$0xff]  }
 0x23d   :  { %v946_v44 = vmax.f32 %v929_v41, 0.0  ;;  %v2882_v41 = vld [vmem:[%s3820_s4 + $0x18] sm:$0xff]  }
 0x23e   :  { %v950_v46 = vpack.c.bf16 %v948_v40, %v947_v38  ;;  %v2880_v38 = vld [vmem:[%s3820_s4 + $0x8] sm:$0xff]   ;;  %v2881_v40 = vld [vmem:[%s3820_s4 + $0x10] sm:$0xff]  }
 0x23f   :  { %v949_v52 = vpack.c.bf16 %v946_v44, %v945_v43  ;;  %v2883_v43 = vld [vmem:[%s3820_s4 + $0x20] sm:$0xff]   ;;  %v2885_v44 = vld [vmem:[%s3820_s4 + $0x30] sm:$0xff]  }
 0x241   :  { %2485 = vmatprep.mubr.bf16.mxu0 %v949_v52 }
 0x242   :  { %2486 = vmatmul.mubr.bf16.vlgmr.msra.gmra.mrb[0].mxu0 %v950_v46 }
 0x243   :  { %2497 = vmatprep.mubr.msk.f32.mxu0 %vm2889_vm1, %v2890_v54 }
 0x315   :  { %v2487_v55 = vpop.f32.mrb[0].mxu0 }
 0x316   :  { %v1056_v57 = vpop.f32.mrb[1].mxu0  ;;  %v1065_v59 = vadd.f32 %v2487_v55, %v3513_v56 }
 0x317   :  { %v2488_v58 = vpop.f32.mrb[2].mxu0  ;;  %v1057_v63 = vadd.f32 %v3513_v56, %v1056_v57 }
 0x318   :  { %v1068_v60 = vadd.f32 %v2488_v58, %v3513_v56  ;;  %v1059_v62 = vpop.f32.mrb[3].mxu0 }
 0x319   :  { %v1060_v1 = vadd.f32 %v3513_v56, %v1059_v62 }
 0x31a   :  { %v2725_v3 = vpack.c.bf16 %v1068_v60, %v1065_v59 }
 0x31b   :  { %v2722_v15 = vpack.c.bf16 %v1060_v1, %v1057_v63 }
 0x31d   :  { %2723 = vmatpush3.bf16.msra.mxu0 %v2722_v15 }
 0x31e   :  { %2724 = vmatprep.subr.bf16.mxu0 %v2888_v53 }
 0x321   :  { %2726 = vmatpush3.bf16.msra.mxu0 %v2725_v3 }
 0x322   :  { %2500 = vmatprep.subr.bf16.mxu0 %v3523_v19 }
 0x324   :  { %2498 = vmatmul.mubr.msk.f32.vlgmr.msra.gmra.mrb[4].mxu0 %vm139_vm0, %v1071_v25 }
 0x325   :  { %2501 = vmatpush3.bf16.msra.mxu0 %v3523_v19  ;;  %2504 = vmatprep.mubr.msk.bf16.mxu0 %vm139_vm0, %v2879_v30 }
 0x326   :  { %2502 = vmatprep.subr.bf16.mxu0 %v3535_v35 }
 0x329   :  { %2503 = vmatpush3.bf16.msra.mxu0 %v3535_v35 }
 0x32a   :  { %2520 = vmatprep.subr.bf16.mxu0 %v3086_v33 }
 0x32c   :  { %2505 = vmatmul.mubr.msk.bf16.vlgmr.msra.gmra.mrb[8].mxu0 %vm139_vm0, %v2880_v38 }
 0x32d   :  { %2508 = vmatprep.mubr.msk.bf16.mxu0 %vm139_vm0, %v2881_v40  ;;  %2521 = vmatpush3.bf16.msra.mxu0 %v3086_v33  ;;  %v2884_v33 = vld [vmem:[%s3820_s4 + $0x28] sm:$0xff]  }
 0x32e   :  { %2522 = vmatprep.subr.bf16.mxu0 %v3099_v36 }
 0x331   :  { %2523 = vmatpush3.bf16.msra.mxu0 %v3099_v36  ;;  %v2886_v36 = vld [vmem:[%s3820_s4 + $0x38] sm:$0xff]  }
 0x332   :  { %2524 = vmatprep.subr.bf16.mxu0 %v3112_v39 }
 0x334   :  { %2509 = vmatmul.mubr.msk.bf16.gmra.mrb[12].mxu0 %vm139_vm0, %v2882_v41 }
 0x335   :  { %2512 = vmatprep.mubr.msk.bf16.mxu0 %vm139_vm0, %v2883_v43  ;;  %2525 = vmatpush3.bf16.msra.mxu0 %v3112_v39  ;;  %v1357_v39 = vpop.permute.xlu0 %1356 }
 0x336   :  { %2526 = vmatprep.subr.bf16.mxu0 %v3125_v42 }
 0x339   :  { %2527 = vmatpush3.bf16.msra.mxu0 %v3125_v42  ;;  %v1362_v42 = vpop.permute.xlu1 %1361 }
 0x33a   :  { %2528 = vmatprep.subr.bf16.mxu0 %v3138_v45 }
 0x33c   :  { %2513 = vmatmul.mubr.msk.bf16.gmra.mrb[16].mxu0 %vm139_vm0, %v2884_v33 }
 0x33d   :  { %2516 = vmatprep.mubr.msk.bf16.mxu0 %vm139_vm0, %v2885_v44  ;;  %2529 = vmatpush3.bf16.msra.mxu0 %v3138_v45  ;;  %v1367_v45 = vpop.permute.xlu0 %1366  ;;  %v1372_v46 = vpop.permute.xlu1 %1371 }
 0x33e   :  { %2530 = vmatprep.subr.bf16.mxu0 %v3151_v48 }
 0x341   :  { %2531 = vmatpush3.bf16.msra.mxu0 %v3151_v48  ;;  %v1377_v48 = vpop.permute.xlu0 %1376  ;;  %v1382_v57 = vpop.permute.xlu1 %1381 }
 0x342   :  { %2532 = vmatprep.subr.bf16.mxu0 %v3158_v49 }
 0x344   :  { %2517 = vmatmul.mubr.msk.bf16.gmra.mrb[20].mxu0 %vm139_vm0, %v2886_v36 }
 0x345   :  { %2533 = vmatpush3.bf16.msra.mxu0 %v3158_v49  ;;  %v1387_v59 = vpop.permute.xlu0 %1386  ;;  %v1392_v62 = vpop.permute.xlu1 %1391 }
 0x346   :  { %2534 = vmatprep.subr.bf16.mxu0 %v3165_v50 }
 0x349   :  { %2535 = vmatpush3.bf16.msra.mxu0 %v3165_v50  ;;  %v1397_v38 = vpop.permute.xlu0 %1396  ;;  %v1402_v40 = vpop.permute.xlu1 %1401 }
 0x34a   :  { %2540 = vmatprep.subr.bf16.mxu0 %v3172_v51 }
 0x3f7   :  { %v3587_v52 = vpop.f32.mrb[4].mxu0 }
 0x3f8   :  { %v2499_v55 = vpop.f32.mrb[5].mxu0 }
 0x3ff   :  { %v2506_v58 = vpop.f32.mrb[8].mxu0 }
 0x400   :  { %v1275_v60 = vpop.f32.mrb[9].mxu0  ;;  %v1436_v63 = vmul.f32 %v2506_v58, %v1367_v45  ;;  %v1412_v58 = vpop.permute.xlu1 %1411 }
 0x401   :  { %v2507_v49 = vpop.f32.mrb[10].mxu0  ;;  %v1434_v50 = vmul.f32 %v1357_v39, %v1275_v60 }
 0x402   :  { %v1437_v1 = vmul.f32 %v2507_v49, %v1372_v46  ;;  %v1278_v3 = vpop.f32.mrb[11].mxu0  ;;  %v1407_v46 = vpop.permute.xlu0 %1406 }
 0x403   :  { %v1435_v15 = vmul.f32 %v1362_v42, %v1278_v3 }
 0x404   :  { %v1451_v25 = vpack.c.bf16 %v1437_v1, %v1436_v63  ;;  %v1422_v63 = vpop.permute.xlu1 %1421 }
 0x405   :  { %v1450_v30 = vpack.c.bf16 %v1435_v15, %v1434_v50 }
 0x407   :  { %v2510_v41 = vpop.f32.mrb[12].mxu0  ;;  %2536 = vmatprep.mubr.bf16.mxu0 %v1450_v30 }
 0x408   :  { %v1291_v43 = vpop.f32.mrb[13].mxu0  ;;  %2537 = vmatmul.mubr.bf16.vlgmr.msra.gmra.mrb[24].mxu0 %v1451_v25  ;;  %v3591_v44 = vmul.f32 %v2510_v41, %v1387_v59  ;;  %v1432_v30 = vpop.permute.xlu1 %1431 }
 0x409   :  { %2541 = vmatpush3.bf16.msra.mxu0 %v3172_v51  ;;  %v2511_v33 = vpop.f32.mrb[14].mxu0  ;;  %2556 = vmatprep.mubr.bf16.mxu0 %v3523_v19  ;;  %v1438_v39 = vmul.f32 %v1377_v48, %v1291_v43 }
 0x40a   :  { %v3593_v36 = vmul.f32 %v2511_v33, %v1392_v62  ;;  %v1294_v45 = vpop.f32.mrb[15].mxu0  ;;  %2542 = vmatprep.subr.bf16.mxu0 %v3178_v9  ;;  %v1417_v62 = vpop.permute.xlu0 %1416 }
 0x40b   :  { %v1439_v42 = vmul.f32 %v1382_v57, %v1294_v45 }
 0x40c   :  { %v1453_v55 = vpack.c.bf16 %v3593_v36, %v3591_v44 }
 0x40d   :  { %v1452_v60 = vpack.c.bf16 %v1439_v42, %v1438_v39  ;;  %2543 = vmatpush3.bf16.msra.mxu0 %v3178_v9 }
 0x40e   :  { %2544 = vmatprep.subr.bf16.mxu0 %v3183_v13  ;;  %v1427_v15 = vpop.permute.xlu0 %1426 }
 0x40f   :  { %v2514_v51 = vpop.f32.mrb[16].mxu0 }
 0x410   :  { %v1307_v19 = vpop.f32.mrb[17].mxu0  ;;  %v3601_v49 = vmul.f32 %v2514_v51, %v1407_v46 }
 0x411   :  { %2545 = vmatpush3.bf16.msra.mxu0 %v3183_v13  ;;  %v2515_v59 = vpop.f32.mrb[18].mxu0  ;;  %v1442_v1 = vmul.f32 %v1397_v38, %v1307_v19 }
 0x412   :  { %v3603_v48 = vmul.f32 %v2515_v59, %v1412_v58  ;;  %v1310_v57 = vpop.f32.mrb[19].mxu0  ;;  %2546 = vmatprep.subr.bf16.mxu0 %v3223_v26 }
 0x413   :  { %v1443_v3 = vmul.f32 %v1402_v40, %v1310_v57 }
 0x414   :  { %v1455_v9 = vpack.c.bf16 %v3603_v48, %v3601_v49 }
 0x415   :  { %v1454_v50 = vpack.c.bf16 %v1443_v3, %v1442_v1  ;;  %2547 = vmatpush3.bf16.msra.mxu0 %v3223_v26  ;;  %v1860_v3 = vld [vmem:[%s3824_s11] sm:$0xff] }
 0x416   :  { %2548 = vmatprep.subr.bf16.mxu0 %v3241_v37 }
 0x417   :  { %v2518_v13 = vpop.f32.mrb[20].mxu0 }
 0x418   :  { %v1323_v25 = vpop.f32.mrb[21].mxu0  ;;  %v3611_v43 = vmul.f32 %v2518_v13, %v1427_v15  ;;  %v1863_v15 = vld [vmem:[%s3824_s11 + $0x18] sm:$0xff] }
 0x419   :  { %2549 = vmatpush3.bf16.msra.mxu0 %v3241_v37  ;;  %v2519_v41 = vpop.f32.mrb[22].mxu0  ;;  %v1446_v40 = vmul.f32 %v1417_v62, %v1323_v25  ;;  %v1844_v37 = vld [vmem:[%s3823_s10] sm:$0xff] }
 0x41a   :  { %v3613_v33 = vmul.f32 %v2519_v41, %v1432_v30  ;;  %v1326_v38 = vpop.f32.mrb[23].mxu0  ;;  %2550 = vmatprep.subr.bf16.mxu0 %v3263_v47  ;;  %v1864_v30 = vld [vmem:[%s3824_s11 + $0x20] sm:$0xff]  ;;  %v1865_v41 = vld [vmem:[%s3824_s11 + $0x28] sm:$0xff] }
 0x41b   :  { %v1447_v44 = vmul.f32 %v1422_v63, %v1326_v38 }
 0x41c   :  { %v1457_v26 = vpack.c.bf16 %v3613_v33, %v3611_v43  ;;  %v2740_v43 = vpack.c.bf16 %v1865_v41, %v1864_v30  ;;  %v1866_v33 = vld [vmem:[%s3824_s11 + $0x30] sm:$0xff] }
 0x41d   :  { %v1456_v36 = vpack.c.bf16 %v1447_v44, %v1446_v40  ;;  %2551 = vmatpush3.bf16.msra.mxu0 %v3263_v47  ;;  %v1845_v47 = vld [vmem:[%s3823_s10 + $0x8] sm:$0xff]  ;;  %v1868_v40 = vld [vmem:[%s3824_s11 + $0x40] sm:$0xff] }
 0x41e   :  { %2552 = vmatprep.subr.bf16.mxu0 %v3281_v61  ;;  %v1869_v44 = vld [vmem:[%s3824_s11 + $0x48] sm:$0xff] }
 0x421   :  { %2553 = vmatpush3.bf16.msra.mxu0 %v3281_v61  ;;  %v2758_v61 = vpack.c.bf16 %v1845_v47, %v1844_v37  ;;  %v1871_v37 = vld [vmem:[%s3824_s11 + $0x58] sm:$0xff] }
 0x422   :  { %2554 = vmatprep.subr.bf16.mxu0 %v3298_v4 }
 0x425   :  { %2555 = vmatpush3.bf16.msra.mxu0 %v3298_v4  ;;  %v1846_v4 = vld [vmem:[%s3823_s10 + $0x10] sm:$0xff] }
 0x426   :  { %2560 = vmatprep.subr.bf16.mxu0 %v3306_v5 }
 0x428   :  { %2557 = vmatmul.mubr.bf16.vlgmr.msra.gmra.mrb[24].mxu0 %v3535_v35 }
 0x429   :  { %2561 = vmatpush3.bf16.msra.mxu0 %v3306_v5  ;;  %2576 = vmatprep.mubr.bf16.mxu0 %v1452_v60  ;;  %v1847_v5 = vld [vmem:[%s3823_s10 + $0x18] sm:$0xff] }
 0x42a   :  { %2562 = vmatprep.subr.bf16.mxu0 %v3313_v6 }
 0x42d   :  { %2563 = vmatpush3.bf16.msra.mxu0 %v3313_v6  ;;  %v2761_v6 = vpack.c.bf16 %v1847_v5, %v1846_v4  ;;  %v1873_v4 = vld [vmem:[%s3824_s11 + $0x68] sm:$0xff] }
 0x42e   :  { %2564 = vmatprep.subr.bf16.mxu0 %v3321_v7 }
 0x431   :  { %2565 = vmatpush3.bf16.msra.mxu0 %v3321_v7  ;;  %v1848_v7 = vld [vmem:[%s3823_s10 + $0x20] sm:$0xff] }
 0x432   :  { %2566 = vmatprep.subr.bf16.mxu0 %v3328_v8 }
 0x435   :  { %2567 = vmatpush3.bf16.msra.mxu0 %v3328_v8  ;;  %v1849_v8 = vld [vmem:[%s3823_s10 + $0x28] sm:$0xff] }
 0x436   :  { %2568 = vmatprep.subr.bf16.mxu0 %v3335_v2 }
 0x439   :  { %2569 = vmatpush3.bf16.msra.mxu0 %v3335_v2  ;;  %v2764_v2 = vpack.c.bf16 %v1849_v8, %v1848_v7  ;;  %v1875_v7 = vld [vmem:[%s3824_s11 + $0x78] sm:$0xff] }
 0x43a   :  { %2570 = vmatprep.subr.bf16.mxu0 %v3342_v10 }
 0x43d   :  { %2571 = vmatpush3.bf16.msra.mxu0 %v3342_v10  ;;  %v1850_v10 = vld [vmem:[%s3823_s10 + $0x30] sm:$0xff] }
 0x43e   :  { %2572 = vmatprep.subr.bf16.mxu0 %v3349_v11 }
 0x441   :  { %2573 = vmatpush3.bf16.msra.mxu0 %v3349_v11  ;;  %v1851_v11 = vld [vmem:[%s3823_s10 + $0x38] sm:$0xff] }
 0x442   :  { %2574 = vmatprep.subr.bf16.mxu0 %v3356_v12 }
 0x445   :  { %2575 = vmatpush3.bf16.msra.mxu0 %v3356_v12  ;;  %v2767_v12 = vpack.c.bf16 %v1851_v11, %v1850_v10 }
 0x446   :  { %2580 = vmatprep.subr.bf16.mxu0 %v3363_v14 }
 0x448   :  { %2577 = vmatmul.mubr.bf16.vlgmr.msra.gmra.mrb[24].mxu0 %v1453_v55 }
 0x449   :  { %2581 = vmatpush3.bf16.msra.mxu0 %v3363_v14  ;;  %2596 = vmatprep.mubr.bf16.mxu0 %v1454_v50  ;;  %v1852_v14 = vld [vmem:[%s3823_s10 + $0x40] sm:$0xff] }
 0x44a   :  { %2582 = vmatprep.subr.bf16.mxu0 %v3370_v18  ;;  %v1770_v50 = vld [vmem:[%s3825_s7] sm:$0x3] }
 0x44d   :  { %2583 = vmatpush3.bf16.msra.mxu0 %v3370_v18  ;;  %v1853_v18 = vld [vmem:[%s3823_s10 + $0x48] sm:$0xff] }
 0x44e   :  { %2584 = vmatprep.subr.bf16.mxu0 %v3383_v20 }
 0x451   :  { %2585 = vmatpush3.bf16.msra.mxu0 %v3383_v20  ;;  %v2770_v20 = vpack.c.bf16 %v1853_v18, %v1852_v14 }
 0x452   :  { %2586 = vmatprep.subr.bf16.mxu0 %v3390_v16 }
 0x455   :  { %2587 = vmatpush3.bf16.msra.mxu0 %v3390_v16  ;;  %v1854_v16 = vld [vmem:[%s3823_s10 + $0x50] sm:$0xff] }
 0x456   :  { %2588 = vmatprep.subr.bf16.mxu0 %v3397_v17 }
 0x459   :  { %2589 = vmatpush3.bf16.msra.mxu0 %v3397_v17  ;;  %v1855_v17 = vld [vmem:[%s3823_s10 + $0x58] sm:$0xff] }
 0x45a   :  { %2590 = vmatprep.subr.bf16.mxu0 %v3404_v0 }
 0x45d   :  { %2591 = vmatpush3.bf16.msra.mxu0 %v3404_v0  ;;  %v2773_v0 = vpack.c.bf16 %v1855_v17, %v1854_v16 }
 0x45e   :  { %2592 = vmatprep.subr.bf16.mxu0 %v3411_v21 }
 0x461   :  { %2593 = vmatpush3.bf16.msra.mxu0 %v3411_v21  ;;  %v1856_v21 = vld [vmem:[%s3823_s10 + $0x60] sm:$0xff] }
 0x462   :  { %2594 = vmatprep.subr.bf16.mxu0 %v3418_v22 }
 0x465   :  { %2595 = vmatpush3.bf16.msra.mxu0 %v3418_v22  ;;  %v1857_v22 = vld [vmem:[%s3823_s10 + $0x68] sm:$0xff] }
 0x466   :  { %2600 = vmatprep.subr.bf16.mxu0 %v3425_v23 }
 0x468   :  { %2597 = vmatmul.mubr.bf16.vlgmr.msra.gmra.mrb[24].mxu0 %v1455_v9  ;;  %v1861_v9 = vld [vmem:[%s3824_s11 + $0x8] sm:$0xff] }
 0x469   :  { %2601 = vmatpush3.bf16.msra.mxu0 %v3425_v23  ;;  %2616 = vmatprep.mubr.bf16.mxu0 %v1456_v36  ;;  %v2776_v23 = vpack.c.bf16 %v1857_v22, %v1856_v21  ;;  %v2734_v13 = vpack.c.bf16 %v1861_v9, %v1860_v3  ;;  %v1870_v36 = vld [vmem:[%s3824_s11 + $0x50] sm:$0xff] }
 0x46a   :  { %2602 = vmatprep.subr.bf16.mxu0 %v3432_v24  ;;  %v2749_v47 = vpack.c.bf16 %v1871_v37, %v1870_v36 }
 0x46d   :  { %2603 = vmatpush3.bf16.msra.mxu0 %v3432_v24  ;;  %v1858_v24 = vld [vmem:[%s3823_s10 + $0x70] sm:$0xff] }
 0x46e   :  { %2604 = vmatprep.subr.bf16.mxu0 %v3445_v27 }
 0x471   :  { %2605 = vmatpush3.bf16.msra.mxu0 %v3445_v27  ;;  %v1859_v27 = vld [vmem:[%s3823_s10 + $0x78] sm:$0xff] }
 0x472   :  { %2606 = vmatprep.subr.bf16.mxu0 %v3452_v28 }
 0x475   :  { %2607 = vmatpush3.bf16.msra.mxu0 %v3452_v28  ;;  %v2779_v28 = vpack.c.bf16 %v1859_v27, %v1858_v24 }
 0x476   :  { %2608 = vmatprep.subr.bf16.mxu0 %v3459_v29 }
 0x479   :  { %2609 = vmatpush3.bf16.msra.mxu0 %v3459_v29 }
 0x47a   :  { %2610 = vmatprep.subr.bf16.mxu0 %v3466_v31 }
 0x47d   :  { %2611 = vmatpush3.bf16.msra.mxu0 %v3466_v31 }
 0x47e   :  { %2612 = vmatprep.subr.bf16.mxu0 %v3473_v32 }
 0x481   :  { %2613 = vmatpush3.bf16.msra.mxu0 %v3473_v32 }
 0x482   :  { %2614 = vmatprep.subr.bf16.mxu0 %v3480_v34 }
 0x485   :  { %2615 = vmatpush3.bf16.msra.mxu0 %v3480_v34 }
 0x486   :  { %2757 = vmatprep.subr.bf16.mxu0 %v2888_v53 }
 0x488   :  { %2617 = vmatmul.mubr.bf16.vlgmr.msra.gmra.mrb[24].mxu0 %v1457_v26  ;;  %v2746_v26 = vpack.c.bf16 %v1869_v44, %v1868_v40 }
 0x489   :  { %2759 = vmatpush3.bf16.msra.mxu0 %v2758_v61  ;;  %2718 = vmatprep.mubr.msk.f32.mxu0 %vm2889_vm1, %v2890_v54  ;;  %v1872_v61 = vld [vmem:[%s3824_s11 + $0x60] sm:$0xff] }
 0x48a   :  { %2760 = vmatprep.subr.bf16.mxu0 %v2888_v53  ;;  %v2752_v5 = vpack.c.bf16 %v1873_v4, %v1872_v61 }
 0x48d   :  { %2762 = vmatpush3.bf16.msra.mxu0 %v2761_v6  ;;  %v1874_v6 = vld [vmem:[%s3824_s11 + $0x70] sm:$0xff] }
 0x48e   :  { %2763 = vmatprep.subr.bf16.mxu0 %v2888_v53  ;;  %v2755_v8 = vpack.c.bf16 %v1875_v7, %v1874_v6 }
 0x491   :  { %2765 = vmatpush3.bf16.msra.mxu0 %v2764_v2 }
 0x492   :  { %2766 = vmatprep.subr.bf16.mxu0 %v2888_v53 }
 0x495   :  { %2768 = vmatpush3.bf16.msra.mxu0 %v2767_v12  ;;  %v2164_v12 = vld [vmem:[%s3826_s12] ss:$0 sm:$0xff] }
 0x496   :  { %2769 = vmatprep.subr.bf16.mxu0 %v2888_v53 }
 0x499   :  { %2771 = vmatpush3.bf16.msra.mxu0 %v2770_v20 }
 0x49a   :  { %2772 = vmatprep.subr.bf16.mxu0 %v2888_v53 }
 0x49d   :  { %2774 = vmatpush3.bf16.msra.mxu0 %v2773_v0 }
 0x49e   :  { %2775 = vmatprep.subr.bf16.mxu0 %v2888_v53 }
 0x4a1   :  { %2777 = vmatpush3.bf16.msra.mxu0 %v2776_v23 }
 0x4a2   :  { %2778 = vmatprep.subr.bf16.mxu0 %v2888_v53 }
 0x4a5   :  { %2780 = vmatpush3.bf16.msra.mxu0 %v2779_v28 }
 0x4a8   :  { %2719 = vmatmul.mubr.f32.vlgmr.msra.gmra.mrb[6].mxu0 %v3587_v52 }
 0x55b   :  { %v2618_v29 = vpop.f32.mrb[24].mxu0 }
 0x55c   :  { %v1696_v31 = vpop.f32.mrb[25].mxu0  ;;  %v1717_v34 = vmax.f32 %v2618_v29, 0.0 }
 0x55d   :  { %v2619_v32 = vpop.f32.mrb[26].mxu0  ;;  %v1715_v39 = vmax.f32 %v1696_v31, 0.0 }
 0x55e   :  { %v1718_v35 = vmax.f32 %v2619_v32, 0.0  ;;  %v1699_v45 = vpop.f32.mrb[27].mxu0 }
 0x55f   :  { %v1716_v42 = vmax.f32 %v1699_v45, 0.0 }
 0x560   :  { %v1720_v46 = vpack.c.bf16 %v1718_v35, %v1717_v34 }
 0x561   :  { %v1719_v55 = vpack.c.bf16 %v1716_v42, %v1715_v39 }
 0x563   :  { %2636 = vmatprep.mubr.bf16.mxu1 %v1719_v55 }
 0x564   :  { %2637 = vmatmul.mubr.bf16.vlgmr.msra.gmra.mrb[20].mxu1 %v1720_v46 }
 0x565   :  { %2648 = vmatprep.mubr.msk.f32.mxu1 %vm2889_vm1, %v2890_v54 }
 0x57b   :  { %v3736_v58 = vpop.f32.mrb[6].mxu0 }
 0x57c   :  { %v2720_v60 = vpop.f32.mrb[7].mxu0 }
 0x637   :  { %v2638_v51 = vpop.f32.mrb[20].mxu1 }
 0x638   :  { %v1755_v52 = vpop.f32.mrb[21].mxu1  ;;  %v1764_v59 = vadd.f32 %v2638_v51, %v3513_v56 }
 0x639   :  { %v2639_v19 = vpop.f32.mrb[22].mxu1  ;;  %v1756_v48 = vadd.f32 %v3513_v56, %v1755_v52 }
 0x63a   :  { %v1767_v62 = vadd.f32 %v2639_v19, %v3513_v56  ;;  %v1758_v49 = vpop.f32.mrb[23].mxu1 }
 0x63b   :  { %v1759_v57 = vadd.f32 %v3513_v56, %v1758_v49  ;;  %v1862_v56 = vld [vmem:[%s3824_s11 + $0x10] sm:$0xff] }
 0x63c   :  { %v2731_v63 = vpack.c.bf16 %v1767_v62, %v1764_v59  ;;  %v2737_v25 = vpack.c.bf16 %v1863_v15, %v1862_v56 }
 0x63d   :  { %v2728_v1 = vpack.c.bf16 %v1759_v57, %v1756_v48 }
 0x63f   :  { %2729 = vmatpush3.bf16.msra.mxu1 %v2728_v1 }
 0x640   :  { %2730 = vmatprep.subr.bf16.mxu1 %v2888_v53 }
 0x643   :  { %2732 = vmatpush3.bf16.msra.mxu1 %v2731_v63 }
 0x644   :  { %2733 = vmatprep.subr.bf16.mxu1 %v2888_v53 }
 0x646   :  { %2649 = vmatmul.mubr.msk.f32.vlgmr.msra.gmra.mrb[24].mxu1 %vm139_vm0, %v1770_v50 }
 0x647   :  { %2735 = vmatpush3.bf16.msra.mxu1 %v2734_v13  ;;  %2683 = vmatprep.mubr.msk.f32.mxu1 %vm2889_vm1, %v2890_v54  ;;  %v1867_v54 = vld [vmem:[%s3824_s11 + $0x38] sm:$0xff] }
 0x648   :  { %2736 = vmatprep.subr.bf16.mxu1 %v2888_v53  ;;  %v2743_v38 = vpack.c.bf16 %v1867_v54, %v1866_v33 }
 0x64b   :  { %2738 = vmatpush3.bf16.msra.mxu1 %v2737_v25 }
 0x64c   :  { %2739 = vmatprep.subr.bf16.mxu1 %v2888_v53 }
 0x64f   :  { %2741 = vmatpush3.bf16.msra.mxu1 %v2740_v43 }
 0x650   :  { %2742 = vmatprep.subr.bf16.mxu1 %v2888_v53 }
 0x653   :  { %2744 = vmatpush3.bf16.msra.mxu1 %v2743_v38 }
 0x654   :  { %2745 = vmatprep.subr.bf16.mxu1 %v2888_v53 }
 0x657   :  { %2747 = vmatpush3.bf16.msra.mxu1 %v2746_v26 }
 0x658   :  { %2748 = vmatprep.subr.bf16.mxu1 %v2888_v53 }
 0x65b   :  { %2750 = vmatpush3.bf16.msra.mxu1 %v2749_v47 }
 0x65c   :  { %2751 = vmatprep.subr.bf16.mxu1 %v2888_v53 }
 0x65f   :  { %2753 = vmatpush3.bf16.msra.mxu1 %v2752_v5 }
 0x660   :  { %2754 = vmatprep.subr.bf16.mxu1 %v2888_v53 }
 0x663   :  { %2756 = vmatpush3.bf16.msra.mxu1 %v2755_v8 }
 0x719   :  { %v1840_v2 = vpop.f32.mrb[24].mxu1 }
 0x71a   :  { %v2650_v10 = vpop.f32.mrb[25].mxu1  ;;  %2684 = vmatmul.mubr.f32.vlgmr.msra.gmra.mrb[26].mxu1 %v1840_v2 }
 0x7ed   :  { %v1942_v11 = vpop.f32.mrb[26].mxu1 }
 0x7ee   :  { %v2013_v14 = vadd.f32 %v3736_v58, %v1942_v11  ;;  %v2685_v18 = vpop.f32.mrb[27].mxu1 }
 0x7f0   :  { %v2023_v20 = vadd.f32 %v2164_v12, %v2013_v14 }
 0x7f2   :  { %2024 = vst [vmem:[%s3827_s15] sm:$0x3] %v2023_v20 }

</bundles_post_ra>
